<compile_context>
chip_gen: v6e
topology: v6e:2x2x1
jax: 0.10.0
libtpu: 0.0.40
codegen_flags: <defaults>
</compile_context>

<pallas_src>
import jax
import jax.numpy as jnp
import numpy as np
from jax.experimental import pallas as pl
from jax.experimental.pallas import tpu as pltpu


def qnet_kernel(x_ref, w1_ref, w_ref, b_ref, out_ref):
    # x_ref   : [TILE_B, F]  bf16  (activations, batch-tiled, real lane width F)
    # w1_ref  : [F, D]       bf16  (layer-1 weight, VMEM resident)
    # w_ref   : [2, D, D]    bf16  (W2 and the folded dueling-head weight)
    # b_ref   : [3, D]       f32   (b1, b2, folded head bias)
    # out_ref : [TILE_B, D]  f32   (lane-dense Q-value slab; cols >= A are junk)

    # Layer 1: Linear + ReLU   (K = F, bf16 in / f32 accumulate)
    h = jnp.dot(x_ref[...], w1_ref[...], preferred_element_type=jnp.float32)
    h = jnp.maximum(h + b_ref[0:1, :], 0.0)

    # Layer 2: Linear + ReLU
    h = jnp.dot(h.astype(jnp.bfloat16), w_ref[0],
                preferred_element_type=jnp.float32)
    h = jnp.maximum(h + b_ref[1:2, :], 0.0)

    # Head with the dueling combine folded into the weights/bias.
    q = jnp.dot(h.astype(jnp.bfloat16), w_ref[1],
                preferred_element_type=jnp.float32)
    out_ref[...] = (q + b_ref[2:3, :]).astype(out_ref.dtype)


def _choose_tile_b(batch):
    """Batch tile: multiple of 8 sublanes, >=2 grid steps when possible, <=2048."""
    b8 = -(-batch // 8) * 8
    if b8 <= 8:
        return b8
    half = max(8, (b8 // 2) // 8 * 8)   # guarantees >= 2 parallel grid steps
    return min(2048, half)


def qnet_forward(x, params, num_actions):
    """x: [B, input_nums] f32; params = (w1_p [F,D] bf16, w_packed [2,D,D] bf16,
    b_packed [3,D] f32). Returns [B, num_actions] f32."""
    w1_p, w_packed, b_packed = params
    B, F = x.shape
    D = w_packed.shape[-1]

    tile_b = _choose_tile_b(B)
    b_pad = pl.cdiv(B, tile_b) * tile_b

    # Only the batch dim is padded; feature lane width stays F (no extra
    # [b_pad, 128] HBM pass like before).
    x_bf = x.astype(jnp.bfloat16)
    if b_pad != B:
        x_bf = jnp.pad(x_bf, ((0, b_pad - B), (0, 0)))

    grid = (b_pad // tile_b,)
    cost = pl.CostEstimate(
        flops=2 * b_pad * (F * D + 2 * D * D),
        transcendentals=0,
        bytes_accessed=(x_bf.size * 2 + w1_p.size * 2 + w_packed.size * 2
                        + b_packed.size * 4 + b_pad * D * 4),
    )

    out = pl.pallas_call(
        qnet_kernel,
        out_shape=jax.ShapeDtypeStruct((b_pad, D), jnp.float32),
        grid_spec=pltpu.PrefetchScalarGridSpec(
            num_scalar_prefetch=0,
            grid=grid,
            in_specs=[
                pl.BlockSpec((tile_b, F), lambda i: (i, 0)),    # activations stream
                pl.BlockSpec((F, D), lambda i: (0, 0)),         # W1, VMEM resident
                pl.BlockSpec((2, D, D), lambda i: (0, 0, 0)),   # W2 + folded head
                pl.BlockSpec((3, D), lambda i: (0, 0)),         # biases
            ],
            out_specs=pl.BlockSpec((tile_b, D), lambda i: (i, 0)),
        ),
        compiler_params=pltpu.CompilerParams(
            dimension_semantics=("parallel",)),
        cost_estimate=cost,
    )(x_bf, w1_p, w_packed, b_packed)

    return out[:B, :num_actions]


def xavier_uniform(key, fan_in, fan_out):
    # Matches nn.init.xavier_uniform_ bound; weight stored as [in, out].
    bound = float(np.sqrt(6.0 / (fan_in + fan_out)))
    return jax.random.uniform(key, (fan_in, fan_out), jnp.float32, -bound, bound)


def init_params(key, input_nums, output_nums, hidden_nums):
    """Returns (raw f32 params for the reference, packed params for the kernel)."""
    k1, k2, k3, k4 = jax.random.split(key, 4)
    w1 = xavier_uniform(k1, input_nums, hidden_nums)
    w2 = xavier_uniform(k2, hidden_nums, hidden_nums)
    wadv = xavier_uniform(k3, hidden_nums, output_nums)
    wval = xavier_uniform(k4, hidden_nums, 1)
    b1 = jnp.zeros((hidden_nums,), jnp.float32)
    b2 = jnp.zeros((hidden_nums,), jnp.float32)
    badv = jnp.zeros((output_nums,), jnp.float32)
    bval = jnp.zeros((1,), jnp.float32)
    raw = (w1, b1, w2, b2, wadv, badv, wval, bval)

    # Fold the dueling combine (val + adv - mean(adv)) into the head weights.
    w_head = wadv - jnp.mean(wadv, axis=1, keepdims=True) + wval      # [H, A]
    b_head = badv - jnp.mean(badv) + bval                             # [A]

    # Lane padding only needs to cover hidden/output (input stays at F lanes).
    D = 128 * int(np.ceil(max(hidden_nums, output_nums) / 128))
    w1_p = jnp.zeros((input_nums, D), jnp.float32).at[:, :hidden_nums].set(w1)
    w_packed = jnp.zeros((2, D, D), jnp.float32)
    w_packed = w_packed.at[0, :hidden_nums, :hidden_nums].set(w2)
    w_packed = w_packed.at[1, :hidden_nums, :output_nums].set(w_head)
    b_packed = jnp.zeros((3, D), jnp.float32)
    b_packed = b_packed.at[0, :hidden_nums].set(b1)
    b_packed = b_packed.at[1, :hidden_nums].set(b2)
    b_packed = b_packed.at[2, :output_nums].set(b_head)

    packed = (w1_p.astype(jnp.bfloat16), w_packed.astype(jnp.bfloat16), b_packed)
    return raw, packed


def qnet_reference(x, raw_params):
    (w1, b1, w2, b2, wadv, badv, wval, bval) = raw_params
    h = jnp.maximum(x @ w1 + b1, 0.0)
    h = jnp.maximum(h @ w2 + b2, 0.0)
    adv = h @ wadv + badv
    val = h @ wval + bval
    return val + adv - jnp.mean(adv, axis=1, keepdims=True)


if __name__ == "__main__":
    input_nums, output_nums, hidden_nums = 16, 4, 32
    batch = 2

    key = jax.random.PRNGKey(0)
    kx, kp = jax.random.split(key)
    x = jax.random.normal(kx, (batch, input_nums), jnp.float32)
    raw_params, packed_params = init_params(kp, input_nums, output_nums, hidden_nums)

    out = qnet_forward(x, packed_params, output_nums)
    out = jax.block_until_ready(out)

    ref = qnet_reference(x, raw_params)
    # bf16 matmul inputs + folded head change summation order/precision vs the
    # f32 reference -> relaxed tolerance.
    np.testing.assert_allclose(np.asarray(out), np.asarray(ref),
                               rtol=2e-2, atol=2e-2)
    assert out.shape == (batch, output_nums)

    print("KERNEL_OK")
</pallas_src>

<mosaic_0001>
module attributes {stable_mosaic.version = 11 : i64} {
  func.func @qnet_kernel(%arg0: i32, %arg1: memref<8x16xbf16, #tpu.memory_space<vmem>>, %arg2: memref<16x128xbf16, #tpu.memory_space<vmem>>, %arg3: memref<2x128x128xbf16, #tpu.memory_space<vmem>>, %arg4: memref<3x128xf32, #tpu.memory_space<vmem>>, %arg5: memref<8x128xf32, #tpu.memory_space<vmem>>) attributes {dimension_semantics = [#tpu.dimension_semantics<parallel>], iteration_bounds = array<i64: 1>, scalar_prefetch = 0 : i64, scratch_operands = 0 : i64, tpu.core_type = #tpu.core_type<tc>, window_params = [{transform_indices = @transform_0, window_bounds = array<i64: 8, 16>}, {pipeline_mode = #tpu.pipeline_mode<synchronous>, transform_indices = @transform_1, window_bounds = array<i64: 16, 128>}, {pipeline_mode = #tpu.pipeline_mode<synchronous>, transform_indices = @transform_2, window_bounds = array<i64: 2, 128, 128>}, {pipeline_mode = #tpu.pipeline_mode<synchronous>, transform_indices = @transform_3, window_bounds = array<i64: 3, 128>}, {transform_indices = @transform_4, window_bounds = array<i64: 8, 128>}]} {
    %c0 = arith.constant 0 : index
    %c0_0 = arith.constant 0 : index
    %0 = vector.load %arg1[%c0, %c0_0] : memref<8x16xbf16, #tpu.memory_space<vmem>>, vector<8x16xbf16>
    %c0_1 = arith.constant 0 : index
    %c0_2 = arith.constant 0 : index
    %1 = vector.load %arg2[%c0_1, %c0_2] : memref<16x128xbf16, #tpu.memory_space<vmem>>, vector<16x128xbf16>
    %cst = arith.constant dense<0.000000e+00> : vector<8x128xf32>
    %2 = tpu.matmul %0, %1, %cst {dimension_numbers = #tpu.dot_dimension_numbers<[1], [0], [0], [1], [0, 0, 1, 1], [], []>} : vector<8x16xbf16>, vector<16x128xbf16>, vector<8x128xf32> -> vector<8x128xf32>
    %c0_3 = arith.constant 0 : index
    %c0_4 = arith.constant 0 : index
    %3 = vector.load %arg4[%c0_3, %c0_4] : memref<3x128xf32, #tpu.memory_space<vmem>>, vector<1x128xf32>
    %4 = vector.broadcast %3 : vector<1x128xf32> to vector<8x128xf32>
    %5 = arith.addf %2, %4 : vector<8x128xf32>
    %cst_5 = arith.constant 0.000000e+00 : f32
    %6 = vector.broadcast %cst_5 : f32 to vector<8x128xf32>
    %7 = arith.maximumf %5, %6 : vector<8x128xf32>
    %8 = arith.truncf %7 : vector<8x128xf32> to vector<8x128xbf16>
    %c0_6 = arith.constant 0 : index
    %c0_7 = arith.constant 0 : index
    %c0_8 = arith.constant 0 : index
    %9 = vector.load %arg3[%c0_6, %c0_7, %c0_8] : memref<2x128x128xbf16, #tpu.memory_space<vmem>>, vector<1x128x128xbf16>
    %10 = vector.shape_cast %9 : vector<1x128x128xbf16> to vector<128x128xbf16>
    %cst_9 = arith.constant dense<0.000000e+00> : vector<8x128xf32>
    %11 = tpu.matmul %8, %10, %cst_9 {dimension_numbers = #tpu.dot_dimension_numbers<[1], [0], [0], [1], [0, 0, 1, 1], [], []>} : vector<8x128xbf16>, vector<128x128xbf16>, vector<8x128xf32> -> vector<8x128xf32>
    %c1 = arith.constant 1 : index
    %c0_10 = arith.constant 0 : index
    %12 = vector.load %arg4[%c1, %c0_10] : memref<3x128xf32, #tpu.memory_space<vmem>>, vector<1x128xf32>
    %13 = vector.broadcast %12 : vector<1x128xf32> to vector<8x128xf32>
    %14 = arith.addf %11, %13 : vector<8x128xf32>
    %cst_11 = arith.constant 0.000000e+00 : f32
    %15 = vector.broadcast %cst_11 : f32 to vector<8x128xf32>
    %16 = arith.maximumf %14, %15 : vector<8x128xf32>
    %17 = arith.truncf %16 : vector<8x128xf32> to vector<8x128xbf16>
    %c1_12 = arith.constant 1 : index
    %c0_13 = arith.constant 0 : index
    %c0_14 = arith.constant 0 : index
    %18 = vector.load %arg3[%c1_12, %c0_13, %c0_14] : memref<2x128x128xbf16, #tpu.memory_space<vmem>>, vector<1x128x128xbf16>
    %19 = vector.shape_cast %18 : vector<1x128x128xbf16> to vector<128x128xbf16>
    %cst_15 = arith.constant dense<0.000000e+00> : vector<8x128xf32>
    %20 = tpu.matmul %17, %19, %cst_15 {dimension_numbers = #tpu.dot_dimension_numbers<[1], [0], [0], [1], [0, 0, 1, 1], [], []>} : vector<8x128xbf16>, vector<128x128xbf16>, vector<8x128xf32> -> vector<8x128xf32>
    %c2 = arith.constant 2 : index
    %c0_16 = arith.constant 0 : index
    %21 = vector.load %arg4[%c2, %c0_16] : memref<3x128xf32, #tpu.memory_space<vmem>>, vector<1x128xf32>
    %22 = vector.broadcast %21 : vector<1x128xf32> to vector<8x128xf32>
    %23 = arith.addf %20, %22 : vector<8x128xf32>
    %c0_17 = arith.constant 0 : index
    %c0_18 = arith.constant 0 : index
    %24 = vector.load %arg5[%c0_17, %c0_18] : memref<8x128xf32, #tpu.memory_space<vmem>>, vector<8x128xf32>
    tpu.vector_store %arg5[%c0_17, %c0_18], %23 {strides = array<i32>} : memref<8x128xf32, #tpu.memory_space<vmem>>, vector<8x128xf32>,
    return
  }
  func.func @transform_0(%arg0: i32) -> (i32, i32) {
    %c0_i32 = arith.constant 0 : i32
    %c0_i32_0 = arith.constant 0 : i32
    return %arg0, %c0_i32 : i32, i32
  }
  func.func @transform_1(%arg0: i32) -> (i32, i32) {
    %c0_i32 = arith.constant 0 : i32
    %c0_i32_0 = arith.constant 0 : i32
    %c0_i32_1 = arith.constant 0 : i32
    return %c0_i32, %c0_i32_0 : i32, i32
  }
  func.func @transform_2(%arg0: i32) -> (i32, i32, i32) {
    %c0_i32 = arith.constant 0 : i32
    %c0_i32_0 = arith.constant 0 : i32
    %c0_i32_1 = arith.constant 0 : i32
    %c0_i32_2 = arith.constant 0 : i32
    return %c0_i32, %c0_i32_0, %c0_i32_1 : i32, i32, i32
  }
  func.func @transform_3(%arg0: i32) -> (i32, i32) {
    %c0_i32 = arith.constant 0 : i32
    %c0_i32_0 = arith.constant 0 : i32
    %c0_i32_1 = arith.constant 0 : i32
    return %c0_i32, %c0_i32_0 : i32, i32
  }
  func.func @transform_4(%arg0: i32) -> (i32, i32) {
    %c0_i32 = arith.constant 0 : i32
    %c0_i32_0 = arith.constant 0 : i32
    return %arg0, %c0_i32 : i32, i32
  }
}

</mosaic_0001>

<bundles_post_ra>
// kernel: tpu_custom_call.1
= control target key start
LH: loop header
LB: loop body
LE: loop exit
PB: predicated region body
PF: predicated region fallthrough
CT: control target
= control target key end

     0   :  { %9 = vsyncpa [#allocation3], 0  ;;  %s628_s0 = inlined_call_operand.hbm [shape: bf16[8,16], index: 0, kind: input, shape index: {}]   ;;  %s629_s1 = inlined_call_operand.hbm [shape: bf16[16,128], index: 1, kind: input, shape index: {}]   ;;  %s630_s2 = inlined_call_operand.hbm [shape: bf16[2,128,128], index: 2, kind: input, shape index: {}]   ;;  %s631_s3 = inlined_call_operand.vmem [shape: f32[3,128], index: 3, kind: input, shape index: {}]   ;;  %s632_s4 = inlined_call_operand.hbm [shape: f32[8,128], index: 4, kind: output, shape index: {}]  }
   0x1   :  { %10 = vsyncpa [#allocation6], 0 }
   0x2   :  { %11 = vsyncpa [#allocation4], 0  ;;  %s554_s15 = smov [#allocation5]  }
   0x3   :  { %s27_s16 = sshll.u32 %s554_s15, 4  ;;  %s28_s16 = int_to_ptr.vmem [resolvable:$true] %s27_s16 }
   0x4   :  { %s476_s17 = scalar_lea.vmem %s28_s16, 128  ;;  %p481_p1 = scmp.lt.s32.totalorder %s28_s16, %s28_s16 }
   0x5   :  { %p477_p0 = scmp.ne.s32.totalorder %s28_s16, %s476_s17  ;;  %p482_p2 = scmp.lt.s32.totalorder %s476_s17, %s476_s17 }
   0x7   :  { %p483_p3 = por %p482_p2, %p481_p1 }
   0x9   :  { %p484_p4 = pnand %p483_p3, %p477_p0 }
   0xb   :  { %487 = shalt.err (!%p484_p4)
}
   0xc   :  { %s555_s18 = smov 64   ;;  %s556_s19 = smov 4  }
   0xd   :  { %33 = dma.hbm_to_vmem [thread:$0]  %s629_s1, 128, %s28_s16, [#allocation6], %s555_s18, %s555_s18, %s556_s19  }
   0xe   :  { %s557_s22 = smov [#allocation2]   ;;  %s558_s24 = smov [#allocation7]  }
   0xf   :  { %s18_s23 = sshll.u32 %s557_s22, 4  ;;  %s39_s25 = sshll.u32 %s558_s24, 4  ;;  %s19_s23 = int_to_ptr.vmem [resolvable:$true] %s18_s23  ;;  %s40_s25 = int_to_ptr.vmem [resolvable:$true] %s39_s25 }
  0x10   :  { %s496_s26 = scalar_lea.vmem %s19_s23, 64  ;;  %p501_p6 = scmp.lt.s32.totalorder %s19_s23, %s19_s23 }
  0x11   :  { %p497_p5 = scmp.ne.s32.totalorder %s19_s23, %s496_s26  ;;  %p502_p7 = scmp.lt.s32.totalorder %s496_s26, %s496_s26 }
  0x13   :  { %p503_p8 = por %p502_p7, %p501_p6 }
  0x15   :  { %p504_p9 = pnand %p503_p8, %p497_p5 }
  0x17   :  { %507 = shalt.err (!%p504_p9)
}
  0x18   :  { %21 = dma.hbm_to_vmem [thread:$0]  %s628_s0, 64, %s19_s23, [#allocation3]  }
  0x19   :  { %s516_s29 = scalar_lea.vmem %s40_s25, 2048  ;;  %p521_p11 = scmp.lt.s32.totalorder %s40_s25, %s40_s25 }
  0x1a   :  { %p517_p10 = scmp.ne.s32.totalorder %s40_s25, %s516_s29  ;;  %p522_p12 = scmp.lt.s32.totalorder %s516_s29, %s516_s29 }
  0x1c   :  { %p523_p13 = por %p522_p12, %p521_p11 }
  0x1e   :  { %p524_p0 = pnand %p523_p13, %p517_p10 }
  0x20   :  { %527 = shalt.err (!%p524_p0)
}
  0x21   :  { %45 = dma.hbm_to_vmem [thread:$0]  %s630_s2, 2048, %s40_s25, [#allocation6], %s555_s18, %s555_s18, %s556_s19  }
  0x22   :  { %548 = dma.done.wait [#allocation3], 64  }
  0x23   :  { %549 = vsyncadd [#allocation3], 4294967232 }
  0x24   :  { %550 = dma.done.wait [#allocation6], 2176  }
  0x25   :  { %551 = vsyncadd [#allocation6], 4294965120  ;;  %v559_v0 = vmov 0.0   ;;  %vm560_vm0 = vmmov 0   ;;  %v451_v1 = vld [vmem:[#allocation5] sm:$0xff]   ;;  %vm72_vm1 = vcmask 130048  }
  0x26   :  { %397 = vmatprep.subr.bf16.mxu0 %v559_v0  ;;  %399 = vmatprep.mubr.msk.bf16.mxu0 %vm560_vm0, %v559_v0  ;;  %v58_v2 = vld [vmem:[#allocation2] sm:$0xf]  ;;  %v452_v3 = vld [vmem:[#allocation7 + $0x38] sm:$0xff]   ;;  %v454_v5 = vld [vmem:[#allocation7 + $0x28] sm:$0xff]   ;;  %s561_s9 = smov [#allocation8]  }
  0x27   :  { %403 = vmatprep.subr.bf16.mxu1 %v559_v0  ;;  %419 = vmatprep.mubr.msk.bf16.mxu1 %vm560_vm0, %v559_v0  ;;  %v453_v4 = vld [vmem:[#allocation7 + $0x30] sm:$0xff]   ;;  %v455_v6 = vld [vmem:[#allocation7 + $0x20] sm:$0xff]   ;;  %v456_v7 = vld [vmem:[#allocation7 + $0x18] sm:$0xff]   ;;  %s346_s10 = sshll.u32 %s561_s9, 4  ;;  %s347_s10 = int_to_ptr.vmem [resolvable:$true] %s346_s10 }
  0x28   :  { %398 = vmatpush3.bf16.msra.mxu0 %v451_v1  ;;  %404 = vmatpush3.bf16.msra.mxu1 %v452_v3  ;;  %v457_v8 = vld [vmem:[#allocation7 + $0x10] sm:$0xff]   ;;  %v458_v9 = vld [vmem:[#allocation7 + $0x8] sm:$0xff]   ;;  %v459_v10 = vld [vmem:[#allocation7] sm:$0xff]   ;;  %s528_s11 = scalar_lea.vmem %s347_s10, 128  ;;  %p533_p2 = scmp.lt.s32.totalorder %s347_s10, %s347_s10 }
  0x29   :  { %423 = vmatprep.subr.bf16.mxu0 %v559_v0  ;;  %405 = vmatprep.subr.bf16.mxu1 %v559_v0  ;;  %v460_v11 = vld [vmem:[#allocation7 + $0x78] sm:$0xff]   ;;  %v461_v12 = vld [vmem:[#allocation7 + $0x70] sm:$0xff]   ;;  %v462_v13 = vld [vmem:[#allocation7 + $0x68] sm:$0xff]   ;;  %p529_p1 = scmp.ne.s32.totalorder %s347_s10, %s528_s11  ;;  %p534_p3 = scmp.lt.s32.totalorder %s528_s11, %s528_s11 }
  0x2a   :  { %v463_v14 = vld [vmem:[#allocation7 + $0x60] sm:$0xff]   ;;  %v464_v15 = vld [vmem:[#allocation7 + $0x58] sm:$0xff]   ;;  %v465_v16 = vld [vmem:[#allocation7 + $0x50] sm:$0xff]  }
  0x2b   :  { %400 = vmatmul.mubr.msk.bf16.vlgmr.msra.gmra.mxu0 %vm72_vm1, %v58_v2  ;;  %v356_v17 = vld [vmem:[%s631_s3] ss:$0 sm:$0xff]  ;;  %v466_v25 = vld [vmem:[#allocation7 + $0x48] sm:$0xff]   ;;  %v467_v26 = vld [vmem:[#allocation7 + $0x40] sm:$0xff]   ;;  %p535_p4 = por %p534_p3, %p533_p2 }
  0x2c   :  { %439 = vmatprep.mubr.msk.bf16.mxu0 %vm560_vm0, %v559_v0  ;;  %406 = vmatpush3.bf16.msra.mxu1 %v453_v4  ;;  %v359_v27 = vld [vmem:[%s631_s3 + $0x1] ss:$0 sm:$0xff]  ;;  %v368_v35 = vld [vmem:[%s631_s3 + $0x2] ss:$0 sm:$0xff] }
  0x2d   :  { %407 = vmatprep.subr.bf16.mxu1 %v559_v0  ;;  %424 = vmatpush3.bf16.msra.mxu0 %v460_v11  ;;  %p536_p5 = pnand %p535_p4, %p529_p1 }
  0x2e   :  { %425 = vmatprep.subr.bf16.mxu0 %v559_v0 }
  0x30   :  { %408 = vmatpush3.bf16.msra.mxu1 %v454_v5 }
  0x31   :  { %409 = vmatprep.subr.bf16.mxu1 %v559_v0  ;;  %426 = vmatpush3.bf16.msra.mxu0 %v461_v12 }
  0x32   :  { %427 = vmatprep.subr.bf16.mxu0 %v559_v0 }
  0x34   :  { %410 = vmatpush3.bf16.msra.mxu1 %v455_v6 }
  0x35   :  { %411 = vmatprep.subr.bf16.mxu1 %v559_v0  ;;  %428 = vmatpush3.bf16.msra.mxu0 %v462_v13 }
  0x36   :  { %429 = vmatprep.subr.bf16.mxu0 %v559_v0 }
  0x38   :  { %412 = vmatpush3.bf16.msra.mxu1 %v456_v7 }
  0x39   :  { %413 = vmatprep.subr.bf16.mxu1 %v559_v0  ;;  %430 = vmatpush3.bf16.msra.mxu0 %v463_v14 }
  0x3a   :  { %431 = vmatprep.subr.bf16.mxu0 %v559_v0 }
  0x3c   :  { %414 = vmatpush3.bf16.msra.mxu1 %v457_v8 }
  0x3d   :  { %415 = vmatprep.subr.bf16.mxu1 %v559_v0  ;;  %432 = vmatpush3.bf16.msra.mxu0 %v464_v15 }
  0x3e   :  { %433 = vmatprep.subr.bf16.mxu0 %v559_v0 }
  0x40   :  { %416 = vmatpush3.bf16.msra.mxu1 %v458_v9 }
  0x41   :  { %417 = vmatprep.subr.bf16.mxu1 %v559_v0  ;;  %434 = vmatpush3.bf16.msra.mxu0 %v465_v16 }
  0x42   :  { %435 = vmatprep.subr.bf16.mxu0 %v559_v0 }
  0x44   :  { %418 = vmatpush3.bf16.msra.mxu1 %v459_v10 }
  0x45   :  { %436 = vmatpush3.bf16.msra.mxu0 %v466_v25 }
  0x46   :  { %437 = vmatprep.subr.bf16.mxu0 %v559_v0 }
  0x49   :  { %438 = vmatpush3.bf16.msra.mxu0 %v467_v26 }
  0xeb   :  { %v110_v18 = vpop.f32.mrf.mxu0 }
  0xec   :  { %v111_v19 = vadd.f32 %v356_v17, %v110_v18 }
  0xed   :  { %v401_v20 = vpop.f32.mrf.mxu0 }
  0xee   :  { %v116_v21 = vmax.f32 %v111_v19, 0.0 }
  0xef   :  { %v113_v22 = vpop.f32.mrf.mxu0 }
  0xf0   :  { %v117_v23 = vpack.c.bf16 %v116_v21, %v116_v21 }
  0xf1   :  { %v402_v24 = vpop.f32.mrf.mxu0 }
  0xf2   :  { %420 = vmatmul.mubr.bf16.vlgmr.msra.gmra.mxu1 %v117_v23 }
 0x1b2   :  { %v221_v28 = vpop.f32.mrf.mxu1 }
 0x1b3   :  { %v222_v29 = vadd.f32 %v359_v27, %v221_v28 }
 0x1b4   :  { %v421_v30 = vpop.f32.mrf.mxu1 }
 0x1b5   :  { %v227_v31 = vmax.f32 %v222_v29, 0.0 }
 0x1b6   :  { %v224_v32 = vpop.f32.mrf.mxu1 }
 0x1b7   :  { %v228_v33 = vpack.c.bf16 %v227_v31, %v227_v31 }
 0x1b8   :  { %v422_v34 = vpop.f32.mrf.mxu1 }
 0x1b9   :  { %440 = vmatmul.mubr.bf16.vlgmr.msra.gmra.mxu0 %v228_v33 }
 0x279   :  { %v333_v36 = vpop.f32.mrf.mxu0 }
 0x27a   :  { %v334_v37 = vadd.f32 %v368_v35, %v333_v36 }
 0x27b   :  { %v441_v38 = vpop.f32.mrf.mxu0 }
 0x27c   :  { %339 = vst [vmem:[#allocation8] sm:$0xff] %v334_v37 }
 0x27d   :  { %v336_v39 = vpop.f32.mrf.mxu0 }
 0x27e   :  { %539 = shalt.err (!%p536_p5)
}
 0x27f   :  { %349 = dma.vmem_to_hbm [thread:$0]  %s347_s10, 128, %s632_s4, [#allocation4]   ;;  %v442_v40 = vpop.f32.mrf.mxu0 }
 0x280   :  { %552 = dma.done.wait [#allocation4], 128  }
 0x281   :  { %553 = vsyncadd [#allocation4], 4294967168 }
 0x282   :  { %353 = vsyncpa [#allocation3], 1 }
 0x283   :  { %354 = vsyncpa [#allocation6], 1 }
 0x284   :  { %355 = vsyncpa [#allocation4], 1 }

</bundles_post_ra>
